<compile_context>
chip_gen: v5e
topology: v5e:2x2
jax: 0.10.0
libtpu: 0.0.40
codegen_flags: <defaults>
</compile_context>

<pallas_src>
import functools

import jax
import jax.numpy as jnp
from jax import lax
from jax.experimental import pallas as pl
from jax.experimental.pallas import tpu as pltpu

EPS = 1e-5  # BatchNorm2d default eps


# --------------------------- fused Pallas kernel ----------------------------

def bottleneck_fused_kernel(x_ref, bd1_ref, s1_ref, b1_ref,
                            b2p_ref, s2_ref, b2_ref,
                            bd3_ref, s3_ref, b3_ref,
                            o_ref, *, img_h):
    """B_IMG stacked images per grid step, lane-flattened (B*H, W*C) layout."""
    M = x_ref.shape[0]                 # B_IMG * H rows in this block
    Wd = s1_ref.shape[-1]              # W * width (stage-1/2 activation lanes)

    x = x_ref[...]                     # (M, W*Cin)  f32

    # ---- conv1 (1x1) + bn1 + relu : block-diagonal matmul, K = W*Cin --------
    y1 = jnp.dot(x.astype(jnp.bfloat16), bd1_ref[...],
                 preferred_element_type=jnp.float32)            # (M, Wd)
    y1 = jnp.maximum(y1 * s1_ref[...] + b1_ref[...], 0.0)

    # ---- conv2 (3x3, pad=1) --------------------------------------------------
    # Row taps via XLU rolls (no padded scratch round-trip, no unaligned
    # sublane slices).  Mask the rows that would cross an image boundary
    # inside the stacked block (blocks always contain whole images).
    row = lax.broadcasted_iota(jnp.int32, (M, Wd), 0) % img_h
    up = jnp.where(row != 0,
                   pltpu.roll(y1, shift=1, axis=0), 0.0)         # input row h-1
    down = jnp.where(row != img_h - 1,
                     pltpu.roll(y1, shift=M - 1, axis=0), 0.0)   # row h+1 (shift M-1 == -1)

    # Three K=Wd partial matmuls accumulated in f32 against the packed banded
    # weight (rows [kh*Wd:(kh+1)*Wd] hold the kh tap of the 3x3 kernel).
    y2 = jnp.dot(up.astype(jnp.bfloat16), b2p_ref[0:Wd, :],
                 preferred_element_type=jnp.float32)
    y2 = y2 + jnp.dot(y1.astype(jnp.bfloat16), b2p_ref[Wd:2 * Wd, :],
                      preferred_element_type=jnp.float32)
    y2 = y2 + jnp.dot(down.astype(jnp.bfloat16), b2p_ref[2 * Wd:3 * Wd, :],
                      preferred_element_type=jnp.float32)        # (M, Wd)
    y2 = jnp.maximum(y2 * s2_ref[...] + b2_ref[...], 0.0)

    # ---- conv3 (1x1) + bn3 + identity + relu ---------------------------------
    y3 = jnp.dot(y2.astype(jnp.bfloat16), bd3_ref[...],
                 preferred_element_type=jnp.float32)             # (M, W*Cout)
    o_ref[...] = jnp.maximum(y3 * s3_ref[...] + b3_ref[...] + x, 0.0)


# ------------------------------- wrappers ------------------------------------

def _choose_block_images(n_imgs, img_h, min_rows=128):
    """Images per grid step: push the matmul M dim toward the MXU row count
    while keeping >=2 grid steps (v7x megacore) when the batch allows it."""
    divisors = [b for b in range(1, n_imgs + 1) if n_imgs % b == 0]
    for b in divisors:
        if b * img_h >= min_rows and (n_imgs // b >= 2 or b == n_imgs):
            return b
    return divisors[-1]


def bottleneck_forward_nhwc(x_nhwc, packed):
    """Hot path: NHWC input, lane-dense (N*H, W*C) kernel I/O."""
    (bd1, s1t, b1t, b2p, s2t, b2t, bd3, s3t, b3t) = packed
    N, H, W, Cin = x_nhwc.shape
    WCout = bd3.shape[1]         # W * Cout
    assert WCout == W * Cin, "identity shortcut requires ch_in == ch_out*expansion"

    B = _choose_block_images(N, H)           # images stacked per grid step
    rows = B * H

    x_flat = x_nhwc.reshape(N * H, W * Cin).astype(jnp.float32)

    def full(a):  # grid-invariant (VMEM-resident) spec for weights / BN vectors
        return pl.BlockSpec(a.shape, lambda n: (0,) * a.ndim)

    # TODO(synk): lane-pack 2 images side-by-side for stages 1-2 (128-lane-dense
    #             intermediates) when batch shape allows; secondary to M-blocking.
    out_flat = pl.pallas_call(
        functools.partial(bottleneck_fused_kernel, img_h=H),
        out_shape=jax.ShapeDtypeStruct((N * H, WCout), jnp.float32),
        grid_spec=pltpu.PrefetchScalarGridSpec(
            num_scalar_prefetch=0,
            grid=(N // B,),
            in_specs=[
                pl.BlockSpec((rows, W * Cin), lambda n: (n, 0)),   # stacked images
                full(bd1), full(s1t), full(b1t),
                full(b2p), full(s2t), full(b2t),
                full(bd3), full(s3t), full(b3t),
            ],
            out_specs=pl.BlockSpec((rows, WCout), lambda n: (n, 0)),
        ),
        compiler_params=pltpu.CompilerParams(
            dimension_semantics=("parallel",),
            vmem_limit_bytes=8 * 1024 * 1024),   # right-sized: config uses <1 MiB
    )(x_flat, bd1, s1t, b1t, b2p, s2t, b2t, bd3, s3t, b3t)

    return out_flat.reshape(N, H, W, WCout // W)


def bottleneck_forward(x_nchw, packed):
    # Layout glue only (PyTorch NCHW interface).  In production call
    # bottleneck_forward_nhwc directly and keep activations in the lane-dense
    # (N*H, W*C) layout between blocks to avoid these HBM transposes.
    x_nhwc = jnp.transpose(x_nchw, (0, 2, 3, 1))
    out = bottleneck_forward_nhwc(x_nhwc, packed)
    return jnp.transpose(out, (0, 3, 1, 2))


# --------------------- weight packing for the lane-dense layout -------------

def _block_diag(w, W):
    """(Ci, Co) -> (W*Ci, W*Co) block-diagonal: per-pixel 1x1 conv in (H, W*C)."""
    Ci, Co = w.shape
    eye = jnp.eye(W, dtype=jnp.float32)
    bd = eye[:, None, :, None] * w[None, :, None, :]       # (W, Ci, W, Co)
    return bd.reshape(W * Ci, W * Co)


def _banded_3x3(w2, W):
    """(3, 3, Ci, Co) HWIO 3x3 weight -> (3*W*Ci, W*Co) packed banded weight.

    Row [kh*W*Ci + w'*Ci + ci], column [w*Co + co] holds w2[kh, w'-w+1, ci, co]
    when |w'-w| <= 1 else 0.  Contracting the three row-shifted views of the
    conv1 output against it computes the full padded 3x3 conv.
    """
    _, _, Ci, Co = w2.shape
    wp = jnp.arange(W)[:, None]        # source pixel w'
    wq = jnp.arange(W)[None, :]        # destination pixel w
    per_kh = []
    for kh in range(3):
        acc = jnp.zeros((W, Ci, W, Co), jnp.float32)
        for kw in range(3):
            mask = (wp - wq == kw - 1).astype(jnp.float32)          # (W, W)
            acc = acc + mask[:, None, :, None] * w2[kh, kw][None, :, None, :]
        per_kh.append(acc.reshape(W * Ci, W * Co))
    return jnp.concatenate(per_kh, axis=0)


def pack_params(w1, s1, b1, w2, s2, b2, w3, s3, b3, W):
    tile = lambda v: jnp.tile(v, (1, W)).astype(jnp.float32)        # (1,C)->(1,W*C)
    return (_block_diag(w1, W).astype(jnp.bfloat16), tile(s1), tile(b1),
            _banded_3x3(w2, W).astype(jnp.bfloat16), tile(s2), tile(b2),
            _block_diag(w3, W).astype(jnp.bfloat16), tile(s3), tile(b3))


# ---------------- Deterministic parameter construction ----------------------

def _folded_bn(keys, c):
    kg, kb, km, kv = keys
    gamma = jax.random.uniform(kg, (c,), minval=0.5, maxval=1.5)
    beta = jax.random.normal(kb, (c,)) * 0.1
    mean = jax.random.normal(km, (c,)) * 0.1
    var = jax.random.uniform(kv, (c,), minval=0.5, maxval=1.5)
    scale = gamma / jnp.sqrt(var + EPS)
    bias = beta - mean * scale
    return (scale.reshape(1, c).astype(jnp.float32),
            bias.reshape(1, c).astype(jnp.float32))


def init_params(key, ch_in, ch_out, W, base_width=64, groups=1):
    width = int(ch_out * (base_width / 64.0)) * groups
    cout4 = ch_out * 4
    ks = jax.random.split(key, 15)
    w1 = (jax.random.normal(ks[0], (ch_in, width)) * 0.1).astype(jnp.float32)
    w2 = (jax.random.normal(ks[1], (3, 3, width, width)) * 0.1).astype(jnp.float32)
    w3 = (jax.random.normal(ks[2], (width, cout4)) * 0.1).astype(jnp.float32)
    s1, b1 = _folded_bn(ks[3:7], width)
    s2, b2 = _folded_bn(ks[7:11], width)
    s3, b3 = _folded_bn(ks[11:15], cout4)
    # Kernel feeds the MXU bf16 operands; round the reference weights the same
    # way so a tight tolerance still validates the structure.
    w1q = w1.astype(jnp.bfloat16).astype(jnp.float32)
    w2q = w2.astype(jnp.bfloat16).astype(jnp.float32)
    w3q = w3.astype(jnp.bfloat16).astype(jnp.float32)
    raw = (w1q, s1, b1, w2q, s2, b2, w3q, s3, b3)
    return raw, pack_params(w1q, s1, b1, w2q, s2, b2, w3q, s3, b3, W)


# ---------------- Pure-JAX reference for validation -------------------------

def ref_forward(x_nchw, w1, s1, b1, w2_hwio, s2, b2, w3, s3, b3):
    """Reference with the same bf16 rounding points as the kernel."""
    x = jnp.transpose(x_nchw, (0, 2, 3, 1)).astype(jnp.float32)
    q = lambda t: t.astype(jnp.bfloat16).astype(jnp.float32)

    def conv(inp, w, pad):
        return lax.conv_general_dilated(
            inp, w, (1, 1), pad, dimension_numbers=('NHWC', 'HWIO', 'NHWC'),
            precision=lax.Precision.HIGHEST)

    y = jnp.maximum(conv(q(x), w1.reshape(1, 1, *w1.shape), [(0, 0), (0, 0)]) * s1 + b1, 0.0)
    y = jnp.maximum(conv(q(y), w2_hwio, [(1, 1), (1, 1)]) * s2 + b2, 0.0)
    y = conv(q(y), w3.reshape(1, 1, *w3.shape), [(0, 0), (0, 0)]) * s3 + b3
    y = jnp.maximum(y + x, 0.0)
    return jnp.transpose(y, (0, 3, 1, 2))


if __name__ == "__main__":
    key = jax.random.PRNGKey(0)
    k_x, k_p = jax.random.split(key)

    N, ch_out = 2, 4
    ch_in = ch_out * 4          # expansion=4 -> identity shortcut is valid
    H = W = 16

    x = jax.random.normal(k_x, (N, ch_in, H, W), dtype=jnp.float32)   # NCHW
    raw, packed = init_params(k_p, ch_in, ch_out, W)

    fwd = jax.jit(bottleneck_forward)
    out = jax.block_until_ready(fwd(x, packed))

    ref = ref_forward(x, *raw)
    assert out.shape == (N, ch_in, H, W)
    assert jnp.allclose(out, ref, atol=1e-3, rtol=1e-3), "mismatch vs JAX reference"

    print("KERNEL_OK")
</pallas_src>

<mosaic_0001>
module attributes {stable_mosaic.version = 11 : i64} {
  func.func @bottleneck_fused_kernel(%arg0: i32, %arg1: memref<32x256xf32, #tpu.memory_space<vmem>>, %arg2: memref<256x64xbf16, #tpu.memory_space<vmem>>, %arg3: memref<1x64xf32, #tpu.memory_space<vmem>>, %arg4: memref<1x64xf32, #tpu.memory_space<vmem>>, %arg5: memref<192x64xbf16, #tpu.memory_space<vmem>>, %arg6: memref<1x64xf32, #tpu.memory_space<vmem>>, %arg7: memref<1x64xf32, #tpu.memory_space<vmem>>, %arg8: memref<64x256xbf16, #tpu.memory_space<vmem>>, %arg9: memref<1x256xf32, #tpu.memory_space<vmem>>, %arg10: memref<1x256xf32, #tpu.memory_space<vmem>>, %arg11: memref<32x256xf32, #tpu.memory_space<vmem>>) attributes {dimension_semantics = [#tpu.dimension_semantics<parallel>], iteration_bounds = array<i64: 1>, scalar_prefetch = 0 : i64, scratch_operands = 0 : i64, tpu.core_type = #tpu.core_type<tc>, window_params = [{transform_indices = @transform_0, window_bounds = array<i64: 32, 256>}, {pipeline_mode = #tpu.pipeline_mode<synchronous>, transform_indices = @transform_1, window_bounds = array<i64: 256, 64>}, {pipeline_mode = #tpu.pipeline_mode<synchronous>, transform_indices = @transform_2, window_bounds = array<i64: 1, 64>}, {pipeline_mode = #tpu.pipeline_mode<synchronous>, transform_indices = @transform_3, window_bounds = array<i64: 1, 64>}, {pipeline_mode = #tpu.pipeline_mode<synchronous>, transform_indices = @transform_4, window_bounds = array<i64: 192, 64>}, {pipeline_mode = #tpu.pipeline_mode<synchronous>, transform_indices = @transform_5, window_bounds = array<i64: 1, 64>}, {pipeline_mode = #tpu.pipeline_mode<synchronous>, transform_indices = @transform_6, window_bounds = array<i64: 1, 64>}, {pipeline_mode = #tpu.pipeline_mode<synchronous>, transform_indices = @transform_7, window_bounds = array<i64: 64, 256>}, {pipeline_mode = #tpu.pipeline_mode<synchronous>, transform_indices = @transform_8, window_bounds = array<i64: 1, 256>}, {pipeline_mode = #tpu.pipeline_mode<synchronous>, transform_indices = @transform_9, window_bounds = array<i64: 1, 256>}, {transform_indices = @transform_10, window_bounds = array<i64: 32, 256>}]} {
    %c0 = arith.constant 0 : index
    %c0_0 = arith.constant 0 : index
    %0 = vector.load %arg1[%c0, %c0_0] : memref<32x256xf32, #tpu.memory_space<vmem>>, vector<32x256xf32>
    %1 = arith.truncf %0 : vector<32x256xf32> to vector<32x256xbf16>
    %c0_1 = arith.constant 0 : index
    %c0_2 = arith.constant 0 : index
    %2 = vector.load %arg2[%c0_1, %c0_2] : memref<256x64xbf16, #tpu.memory_space<vmem>>, vector<256x64xbf16>
    %cst = arith.constant dense<0.000000e+00> : vector<32x64xf32>
    %3 = tpu.matmul %1, %2, %cst {dimension_numbers = #tpu.dot_dimension_numbers<[1], [0], [0], [1], [0, 0, 1, 1], [], []>} : vector<32x256xbf16>, vector<256x64xbf16>, vector<32x64xf32> -> vector<32x64xf32>
    %c0_3 = arith.constant 0 : index
    %c0_4 = arith.constant 0 : index
    %4 = vector.load %arg3[%c0_3, %c0_4] : memref<1x64xf32, #tpu.memory_space<vmem>>, vector<1x64xf32>
    %5 = vector.broadcast %4 : vector<1x64xf32> to vector<32x64xf32>
    %6 = arith.mulf %3, %5 : vector<32x64xf32>
    %c0_5 = arith.constant 0 : index
    %c0_6 = arith.constant 0 : index
    %7 = vector.load %arg4[%c0_5, %c0_6] : memref<1x64xf32, #tpu.memory_space<vmem>>, vector<1x64xf32>
    %8 = vector.broadcast %7 : vector<1x64xf32> to vector<32x64xf32>
    %9 = arith.addf %6, %8 : vector<32x64xf32>
    %cst_7 = arith.constant 0.000000e+00 : f32
    %10 = vector.broadcast %cst_7 : f32 to vector<32x64xf32>
    %11 = arith.maximumf %9, %10 : vector<32x64xf32>
    %12 = tpu.iota {dimensions = array<i32: 0>} : vector<32x64xi32>
    %c16_i32 = arith.constant 16 : i32
    %c0_i32 = arith.constant 0 : i32
    %13 = arith.cmpi eq, %c16_i32, %c0_i32 : i32
    %c1_i32 = arith.constant 1 : i32
    %14 = arith.select %13, %c1_i32, %c16_i32 : i32
    %15 = vector.broadcast %14 : i32 to vector<32x64xi32>
    %16 = arith.remsi %12, %15 : vector<32x64xi32>
    %c0_i32_8 = arith.constant 0 : i32
    %17 = vector.broadcast %c0_i32_8 : i32 to vector<32x64xi32>
    %18 = arith.cmpi ne, %16, %17 : vector<32x64xi32>
    %c0_i32_9 = arith.constant 0 : i32
    %19 = vector.broadcast %c0_i32_9 : i32 to vector<32x64xi32>
    %20 = arith.cmpi slt, %16, %19 : vector<32x64xi32>
    %c0_i32_10 = arith.constant 0 : i32
    %21 = arith.cmpi slt, %14, %c0_i32_10 : i32
    %22 = vector.broadcast %21 : i1 to vector<32x64xi1>
    %23 = vector.broadcast %22 : vector<32x64xi1> to vector<32x64xi1>
    %24 = arith.xori %20, %23 : vector<32x64xi1>
    %25 = arith.andi %24, %18 : vector<32x64xi1>
    %26 = vector.broadcast %14 : i32 to vector<32x64xi32>
    %27 = arith.addi %16, %26 : vector<32x64xi32>
    %28 = arith.select %25, %27, %16 : vector<32x64xi1>, vector<32x64xi32>
    %c0_i32_11 = arith.constant 0 : i32
    %29 = vector.broadcast %c0_i32_11 : i32 to vector<32x64xi32>
    %30 = arith.cmpi ne, %28, %29 : vector<32x64xi32>
    %c1_i32_12 = arith.constant 1 : i32
    %31 = tpu.dynamic_rotate %11 by %c1_i32_12 dim 0 : vector<32x64xf32>, i32 -> vector<32x64xf32>
    %cst_13 = arith.constant 0.000000e+00 : f32
    %32 = vector.broadcast %cst_13 : f32 to vector<32x64xf32>
    %33 = arith.select %30, %31, %32 : vector<32x64xi1>, vector<32x64xf32>
    %c15_i32 = arith.constant 15 : i32
    %34 = vector.broadcast %c15_i32 : i32 to vector<32x64xi32>
    %35 = arith.cmpi ne, %28, %34 : vector<32x64xi32>
    %c31_i32 = arith.constant 31 : i32
    %36 = tpu.dynamic_rotate %11 by %c31_i32 dim 0 : vector<32x64xf32>, i32 -> vector<32x64xf32>
    %cst_14 = arith.constant 0.000000e+00 : f32
    %37 = vector.broadcast %cst_14 : f32 to vector<32x64xf32>
    %38 = arith.select %35, %36, %37 : vector<32x64xi1>, vector<32x64xf32>
    %39 = arith.truncf %33 : vector<32x64xf32> to vector<32x64xbf16>
    %c0_15 = arith.constant 0 : index
    %c0_16 = arith.constant 0 : index
    %40 = vector.load %arg5[%c0_15, %c0_16] : memref<192x64xbf16, #tpu.memory_space<vmem>>, vector<64x64xbf16>
    %cst_17 = arith.constant dense<0.000000e+00> : vector<32x64xf32>
    %41 = tpu.matmul %39, %40, %cst_17 {dimension_numbers = #tpu.dot_dimension_numbers<[1], [0], [0], [1], [0, 0, 1, 1], [], []>} : vector<32x64xbf16>, vector<64x64xbf16>, vector<32x64xf32> -> vector<32x64xf32>
    %42 = arith.truncf %11 : vector<32x64xf32> to vector<32x64xbf16>
    %c64 = arith.constant 64 : index
    %c0_18 = arith.constant 0 : index
    %43 = vector.load %arg5[%c64, %c0_18] : memref<192x64xbf16, #tpu.memory_space<vmem>>, vector<64x64xbf16>
    %cst_19 = arith.constant dense<0.000000e+00> : vector<32x64xf32>
    %44 = tpu.matmul %42, %43, %cst_19 {dimension_numbers = #tpu.dot_dimension_numbers<[1], [0], [0], [1], [0, 0, 1, 1], [], []>} : vector<32x64xbf16>, vector<64x64xbf16>, vector<32x64xf32> -> vector<32x64xf32>
    %45 = arith.addf %41, %44 : vector<32x64xf32>
    %46 = arith.truncf %38 : vector<32x64xf32> to vector<32x64xbf16>
    %c128 = arith.constant 128 : index
    %c0_20 = arith.constant 0 : index
    %47 = vector.load %arg5[%c128, %c0_20] : memref<192x64xbf16, #tpu.memory_space<vmem>>, vector<64x64xbf16>
    %cst_21 = arith.constant dense<0.000000e+00> : vector<32x64xf32>
    %48 = tpu.matmul %46, %47, %cst_21 {dimension_numbers = #tpu.dot_dimension_numbers<[1], [0], [0], [1], [0, 0, 1, 1], [], []>} : vector<32x64xbf16>, vector<64x64xbf16>, vector<32x64xf32> -> vector<32x64xf32>
    %49 = arith.addf %45, %48 : vector<32x64xf32>
    %c0_22 = arith.constant 0 : index
    %c0_23 = arith.constant 0 : index
    %50 = vector.load %arg6[%c0_22, %c0_23] : memref<1x64xf32, #tpu.memory_space<vmem>>, vector<1x64xf32>
    %51 = vector.broadcast %50 : vector<1x64xf32> to vector<32x64xf32>
    %52 = arith.mulf %49, %51 : vector<32x64xf32>
    %c0_24 = arith.constant 0 : index
    %c0_25 = arith.constant 0 : index
    %53 = vector.load %arg7[%c0_24, %c0_25] : memref<1x64xf32, #tpu.memory_space<vmem>>, vector<1x64xf32>
    %54 = vector.broadcast %53 : vector<1x64xf32> to vector<32x64xf32>
    %55 = arith.addf %52, %54 : vector<32x64xf32>
    %cst_26 = arith.constant 0.000000e+00 : f32
    %56 = vector.broadcast %cst_26 : f32 to vector<32x64xf32>
    %57 = arith.maximumf %55, %56 : vector<32x64xf32>
    %58 = arith.truncf %57 : vector<32x64xf32> to vector<32x64xbf16>
    %c0_27 = arith.constant 0 : index
    %c0_28 = arith.constant 0 : index
    %59 = vector.load %arg8[%c0_27, %c0_28] : memref<64x256xbf16, #tpu.memory_space<vmem>>, vector<64x256xbf16>
    %cst_29 = arith.constant dense<0.000000e+00> : vector<32x256xf32>
    %60 = tpu.matmul %58, %59, %cst_29 {dimension_numbers = #tpu.dot_dimension_numbers<[1], [0], [0], [1], [0, 0, 1, 1], [], []>} : vector<32x64xbf16>, vector<64x256xbf16>, vector<32x256xf32> -> vector<32x256xf32>
    %c0_30 = arith.constant 0 : index
    %c0_31 = arith.constant 0 : index
    %61 = vector.load %arg9[%c0_30, %c0_31] : memref<1x256xf32, #tpu.memory_space<vmem>>, vector<1x256xf32>
    %62 = vector.broadcast %61 : vector<1x256xf32> to vector<32x256xf32>
    %63 = arith.mulf %60, %62 : vector<32x256xf32>
    %c0_32 = arith.constant 0 : index
    %c0_33 = arith.constant 0 : index
    %64 = vector.load %arg10[%c0_32, %c0_33] : memref<1x256xf32, #tpu.memory_space<vmem>>, vector<1x256xf32>
    %65 = vector.broadcast %64 : vector<1x256xf32> to vector<32x256xf32>
    %66 = arith.addf %63, %65 : vector<32x256xf32>
    %67 = arith.addf %66, %0 : vector<32x256xf32>
    %cst_34 = arith.constant 0.000000e+00 : f32
    %68 = vector.broadcast %cst_34 : f32 to vector<32x256xf32>
    %69 = arith.maximumf %67, %68 : vector<32x256xf32>
    %c0_35 = arith.constant 0 : index
    %c0_36 = arith.constant 0 : index
    %70 = vector.load %arg11[%c0_35, %c0_36] : memref<32x256xf32, #tpu.memory_space<vmem>>, vector<32x256xf32>
    tpu.vector_store %arg11[%c0_35, %c0_36], %69 {strides = array<i32>} : memref<32x256xf32, #tpu.memory_space<vmem>>, vector<32x256xf32>,
    return
  }
  func.func @transform_0(%arg0: i32) -> (i32, i32) {
    %c0_i32 = arith.constant 0 : i32
    %c0_i32_0 = arith.constant 0 : i32
    return %arg0, %c0_i32 : i32, i32
  }
  func.func @transform_1(%arg0: i32) -> (i32, i32) {
    %c0_i32 = arith.constant 0 : i32
    %c0_i32_0 = arith.constant 0 : i32
    %c0_i32_1 = arith.constant 0 : i32
    return %c0_i32, %c0_i32_0 : i32, i32
  }
  func.func @transform_2(%arg0: i32) -> (i32, i32) {
    %c0_i32 = arith.constant 0 : i32
    %c0_i32_0 = arith.constant 0 : i32
    %c0_i32_1 = arith.constant 0 : i32
    return %c0_i32, %c0_i32_0 : i32, i32
  }
  func.func @transform_3(%arg0: i32) -> (i32, i32) {
    %c0_i32 = arith.constant 0 : i32
    %c0_i32_0 = arith.constant 0 : i32
    %c0_i32_1 = arith.constant 0 : i32
    return %c0_i32, %c0_i32_0 : i32, i32
  }
  func.func @transform_4(%arg0: i32) -> (i32, i32) {
    %c0_i32 = arith.constant 0 : i32
    %c0_i32_0 = arith.constant 0 : i32
    %c0_i32_1 = arith.constant 0 : i32
    return %c0_i32, %c0_i32_0 : i32, i32
  }
  func.func @transform_5(%arg0: i32) -> (i32, i32) {
    %c0_i32 = arith.constant 0 : i32
    %c0_i32_0 = arith.constant 0 : i32
    %c0_i32_1 = arith.constant 0 : i32
    return %c0_i32, %c0_i32_0 : i32, i32
  }
  func.func @transform_6(%arg0: i32) -> (i32, i32) {
    %c0_i32 = arith.constant 0 : i32
    %c0_i32_0 = arith.constant 0 : i32
    %c0_i32_1 = arith.constant 0 : i32
    return %c0_i32, %c0_i32_0 : i32, i32
  }
  func.func @transform_7(%arg0: i32) -> (i32, i32) {
    %c0_i32 = arith.constant 0 : i32
    %c0_i32_0 = arith.constant 0 : i32
    %c0_i32_1 = arith.constant 0 : i32
    return %c0_i32, %c0_i32_0 : i32, i32
  }
  func.func @transform_8(%arg0: i32) -> (i32, i32) {
    %c0_i32 = arith.constant 0 : i32
    %c0_i32_0 = arith.constant 0 : i32
    %c0_i32_1 = arith.constant 0 : i32
    return %c0_i32, %c0_i32_0 : i32, i32
  }
  func.func @transform_9(%arg0: i32) -> (i32, i32) {
    %c0_i32 = arith.constant 0 : i32
    %c0_i32_0 = arith.constant 0 : i32
    %c0_i32_1 = arith.constant 0 : i32
    return %c0_i32, %c0_i32_0 : i32, i32
  }
  func.func @transform_10(%arg0: i32) -> (i32, i32) {
    %c0_i32 = arith.constant 0 : i32
    %c0_i32_0 = arith.constant 0 : i32
    return %arg0, %c0_i32 : i32, i32
  }
}

</mosaic_0001>

<bundles_post_ra>
// kernel: bottleneck_forward.1
= control target key start
LH: loop header
LB: loop body
LE: loop exit
PB: predicated region body
PF: predicated region fallthrough
CT: control target
= control target key end

     0   :  { %vm365_vm0 = vcmask 523264   ;;  %v234_v59 = vlaneseq  ;;  %s1174_s1 = inlined_call_operand.vmem [shape: bf16[256,64], index: 1, kind: input, shape index: {}]   ;;  %s1175_s0 = inlined_call_operand.vmem [shape: f32[32,256], index: 0, kind: input, shape index: {}]   ;;  %s1176_s2 = inlined_call_operand.vmem [shape: f32[1,64], index: 2, kind: input, shape index: {}]   ;;  %s1177_s3 = inlined_call_operand.vmem [shape: f32[1,64], index: 3, kind: input, shape index: {}]   ;;  %s1178_s4 = inlined_call_operand.vmem [shape: bf16[192,64], index: 4, kind: input, shape index: {}]   ;;  %s1179_s5 = inlined_call_operand.vmem [shape: f32[1,64], index: 5, kind: input, shape index: {}]   ;;  %s1180_s6 = inlined_call_operand.vmem [shape: f32[1,64], index: 6, kind: input, shape index: {}]   ;;  %s1181_s7 = inlined_call_operand.vmem [shape: bf16[64,256], index: 7, kind: input, shape index: {}]   ;;  %s1182_s8 = inlined_call_operand.vmem [shape: f32[1,256], index: 8, kind: input, shape index: {}]   ;;  %s1183_s9 = inlined_call_operand.vmem [shape: f32[1,256], index: 9, kind: input, shape index: {}]   ;;  %s1184_s10 = inlined_call_operand.vmem [shape: f32[32,256], index: 10, kind: output, shape index: {}]  }
   0x1   :  { %v834_v0 = vld [vmem:[%s1174_s1 + $0x38] sm:$0xff]  ;;  %v833_v2 = vld [vmem:[%s1174_s1 + $0x30] sm:$0xff]  ;;  %v832_v4 = vld [vmem:[%s1174_s1 + $0x28] sm:$0xff] }
   0x2   :  { %v842_v1 = vld [vmem:[%s1174_s1 + $0x78] sm:$0xff]  ;;  %176 = vmatpush.bf16.msra.mxu0 %v834_v0  ;;  %v841_v3 = vld [vmem:[%s1174_s1 + $0x70] sm:$0xff]  ;;  %v840_v5 = vld [vmem:[%s1174_s1 + $0x68] sm:$0xff] }
   0x3   :  { %195 = vmatpush.bf16.msra.mxu1 %v842_v1  ;;  %v831_v6 = vld [vmem:[%s1174_s1 + $0x20] sm:$0xff]  ;;  %v830_v8 = vld [vmem:[%s1174_s1 + $0x18] sm:$0xff]  ;;  %v829_v10 = vld [vmem:[%s1174_s1 + $0x10] sm:$0xff]  ;;  %v235_v1 = vshrl.u32 %v234_v59, 7 }
   0x4   :  { %v839_v7 = vld [vmem:[%s1174_s1 + $0x60] sm:$0xff]  ;;  %v838_v9 = vld [vmem:[%s1174_s1 + $0x58] sm:$0xff]  ;;  %v837_v11 = vld [vmem:[%s1174_s1 + $0x50] sm:$0xff] }
   0x5   :  { %v828_v12 = vld [vmem:[%s1174_s1 + $0x8] sm:$0xff]  ;;  %v827_v14 = vld [vmem:[%s1174_s1] sm:$0xff]  ;;  %v982_v17 = vld [vmem:[%s1175_s0 + $0x10] sm:$0xff]  ;;  %vm295_vm1 = vcmp.lt.s32.totalorder %v235_v1, 1  ;;  %vm312_vm3 = vcmp.lt.s32.totalorder %v235_v1, 7 }
   0x6   :  { %177 = vmatpush.bf16.msra.mxu0 %v833_v2  ;;  %v836_v13 = vld [vmem:[%s1174_s1 + $0x48] sm:$0xff]  ;;  %v835_v15 = vld [vmem:[%s1174_s1 + $0x40] sm:$0xff]  ;;  %v992_v19 = vld [vmem:[%s1175_s0 + $0x18] sm:$0xff] }
   0x7   :  { %196 = vmatpush.bf16.msra.mxu1 %v841_v3  ;;  %v977_v16 = vld [vmem:[%s1175_s0] sm:$0xff]  ;;  %v987_v18 = vld [vmem:[%s1175_s0 + $0x8] sm:$0xff]  ;;  %v1006_v23 = vld [vmem:[%s1175_s0 + $0x30] sm:$0xff]  ;;  %v243_v3 = vand.u32 15, %v235_v1 }
   0x8   :  { %v44_v20 = vpack.c.bf16 %v982_v17, %v977_v16  ;;  %v45_v21 = vpack.c.bf16 %v992_v19, %v987_v18  ;;  %v1001_v22 = vld [vmem:[%s1175_s0 + $0x20] sm:$0xff]  ;;  %v1011_v24 = vld [vmem:[%s1175_s0 + $0x28] sm:$0xff]  ;;  %v1016_v25 = vld [vmem:[%s1175_s0 + $0x38] sm:$0xff] }
   0x9   :  { %v46_v26 = vpack.c.bf16 %v1006_v23, %v1001_v22  ;;  %v47_v27 = vpack.c.bf16 %v1016_v25, %v1011_v24  ;;  %v850_v28 = vld [vmem:[%s1178_s4 + $0x38] sm:$0xff]  ;;  %v849_v29 = vld [vmem:[%s1178_s4 + $0x30] sm:$0xff]  ;;  %v848_v30 = vld [vmem:[%s1178_s4 + $0x28] sm:$0xff]  ;;  %vm287_vm2 = vcmp.ne.s32.totalorder %v243_v3, 0 }
   0xa   :  { %178 = vmatpush.bf16.msra.mxu0 %v832_v4  ;;  %376 = vmatpush.bf16.msra.mxu2 %v850_v28  ;;  %v847_v31 = vld [vmem:[%s1178_s4 + $0x20] sm:$0xff]  ;;  %v846_v32 = vld [vmem:[%s1178_s4 + $0x18] sm:$0xff]  ;;  %v845_v34 = vld [vmem:[%s1178_s4 + $0x10] sm:$0xff] }
   0xb   :  { %197 = vmatpush.bf16.msra.mxu1 %v840_v5  ;;  %425 = vmatpush.bf16.msra.mxu3 %v846_v32  ;;  %v854_v33 = vld [vmem:[%s1178_s4 + $0x58] sm:$0xff]  ;;  %v844_v35 = vld [vmem:[%s1178_s4 + $0x8] sm:$0xff]  ;;  %v853_v38 = vld [vmem:[%s1178_s4 + $0x50] sm:$0xff] }
   0xc   :  { %v843_v39 = vld [vmem:[%s1178_s4] sm:$0xff]  ;;  %v852_v42 = vld [vmem:[%s1178_s4 + $0x48] sm:$0xff]  ;;  %v858_v59 = vld [vmem:[%s1181_s7 + $0x14] sm:$0xf0] }
   0xd   :  { %v867_v41 = vld [vmem:[%s1176_s2] ss:$0 sm:$0xff]  ;;  %v855_v3 = vld [vmem:[%s1181_s7 + $0x4] sm:$0xf] }
   0xe   :  { %179 = vmatpush.bf16.msra.mxu0 %v831_v6  ;;  %377 = vmatpush.bf16.msra.mxu2 %v849_v29  ;;  %v868_v44 = vld [vmem:[%s1177_s3] ss:$0 sm:$0xff] }
   0xf   :  { %198 = vmatpush.bf16.msra.mxu1 %v839_v7  ;;  %426 = vmatpush.bf16.msra.mxu3 %v845_v34  ;;  %v851_v45 = vld [vmem:[%s1178_s4 + $0x40] sm:$0xff] }
  0x12   :  { %180 = vmatpush.bf16.msra.mxu0 %v830_v8  ;;  %378 = vmatpush.bf16.msra.mxu2 %v848_v30 }
  0x13   :  { %199 = vmatpush.bf16.msra.mxu1 %v838_v9  ;;  %427 = vmatpush.bf16.msra.mxu3 %v844_v35 }
  0x16   :  { %181 = vmatpush.bf16.msra.mxu0 %v829_v10  ;;  %379 = vmatpush.bf16.msra.mxu2 %v847_v31 }
  0x17   :  { %200 = vmatpush.bf16.msra.mxu1 %v837_v11  ;;  %428 = vmatpush.bf16.msra.mxu3 %v843_v39  ;;  %v236_v11 = vadd.s32 8, %v235_v1 }
  0x1a   :  { %182 = vmatpush.bf16.msra.mxu0 %v828_v12  ;;  %484 = vmatpush.bf16.msrb.mxu2 %v854_v33 }
  0x1b   :  { %201 = vmatpush.bf16.msra.mxu1 %v836_v13 }
  0x1e   :  { %183 = vmatpush.bf16.msra.mxu0 %v827_v14  ;;  %485 = vmatpush.bf16.msrb.mxu2 %v853_v38 }
  0x1f   :  { %202 = vmatpush.bf16.msra.mxu1 %v835_v15 }
  0x21   :  { %184 = vmatmul.bf16.vlgmr.msra.gmra.mxu0 %v44_v20  ;;  %v250_v20 = vand.u32 15, %v236_v11 }
  0x22   :  { %203 = vmatmul.bf16.vlgmr.msra.gmra.mxu1 %v45_v21  ;;  %486 = vmatpush.bf16.msrb.mxu2 %v852_v42 }
  0x23   :  { %vm305_vm4 = vcmp.ne.s32.totalorder %v250_v20, 15 }
  0x26   :  { %487 = vmatpush.bf16.msrb.mxu2 %v851_v45  ;;  %v817_v45 = vld [vmem:[%s1181_s7 + $0x30] sm:$0xf] }
  0x31   :  { %189 = vmatmul.bf16.gmra.mxu0 %v46_v26  ;;  %v237_v26 = vadd.s32 16, %v235_v1 }
  0x32   :  { %208 = vmatmul.bf16.gmra.mxu1 %v47_v27 }
  0x33   :  { %v257_v28 = vand.u32 15, %v237_v26 }
  0x35   :  { %vm289_vm5 = vcmp.ne.s32.totalorder %v257_v28, 0 }
  0x9e   :  { %v185_v36 = vpop.f32.mrf.mxu0 }
  0x9f   :  { %v204_v37 = vpop.f32.mrf.mxu1 }
  0xa0   :  { %v205_v40 = vadd.f32 %v204_v37, %v185_v36  ;;  %v238_v36 = vadd.s32 24, %v235_v1  ;;  %v793_v1 = vld [vmem:[%s1181_s7] sm:$0xf] }
  0xa2   :  { %v218_v43 = vmul.f32 %v867_v41, %v205_v40  ;;  %v264_v39 = vand.u32 15, %v238_v36 }
  0xa4   :  { %v226_v49 = vadd.f32 %v868_v44, %v218_v43  ;;  %vm307_vm6 = vcmp.ne.s32.totalorder %v264_v39, 15 }
  0xa6   :  { %v187_v46 = vpop.f32.mrf.mxu0  ;;  %v230_v52 = vmax.f32 %v226_v49, 0.0  ;;  %v860_v49 = vld [vmem:[%s1181_s7 + $0x24] sm:$0xf0] }
  0xa7   :  { %v206_v47 = vpop.f32.mrf.mxu1 }
  0xa8   :  { %v207_v48 = vadd.f32 %v206_v47, %v187_v46  ;;  %v291_v9 = vrot.slane %v230_v52, 7  ;;  %v308_v30 = vrot.slane %v230_v52, 1  ;;  %v862_v46 = vld [vmem:[%s1181_s7 + $0x34] sm:$0xf0] }
  0xa9   :  { %v818_v47 = vor.u32 %v862_v46, %v817_v45 }
  0xaa   :  { %v219_v50 = vmul.f32 %v867_v41, %v207_v48  ;;  %v809_v48 = vld [vmem:[%s1181_s7 + $0x20] sm:$0xf] }
  0xab   :  { %583 = vmatpush.bf16.msrb.mxu3 %v818_v47 }
  0xac   :  { %v227_v51 = vadd.f32 %v868_v44, %v219_v50  ;;  %v810_v50 = vor.u32 %v860_v49, %v809_v48  ;;  %v617_v49 = vld [vmem:[%s1182_s8] sm:$0x3] }
  0xae   :  { %v231_v53 = vmax.f32 %v227_v51, 0.0  ;;  %v190_v54 = vpop.f32.mrf.mxu0 }
  0xaf   :  { %v209_v55 = vpop.f32.mrf.mxu1  ;;  %584 = vmatpush.bf16.msrb.mxu3 %v810_v50  ;;  %v631_v50 = vld [vmem:[%s1183_s9] sm:$0x3] }
  0xb0   :  { %v331_v56 = vpack.c.bf16 %v231_v53, %v230_v52  ;;  %v210_v57 = vadd.f32 %v209_v55, %v190_v54  ;;  %v292_v6 = vrot.slane %v231_v53, 7  ;;  %v309_v21 = vrot.slane %v231_v53, 1  ;;  %v861_v52 = vld [vmem:[%s1181_s7 + $0x34] sm:$0xf]  ;;  %v819_v53 = vld [vmem:[%s1181_s7 + $0x38] sm:$0xf0] }
  0xb1   :  { %v822_v54 = vor.u32 %v861_v52, %v819_v53  ;;  %v859_v55 = vld [vmem:[%s1181_s7 + $0x24] sm:$0xf]  ;;  %v634_v52 = vperm.slane %v631_v50, 1 }
  0xb2   :  { %753 = vmatmul.msk.bf16.vlgmr.msra.gmra.mxu2 %vm365_vm0, %v331_v56  ;;  %v220_v58 = vmul.f32 %v867_v41, %v210_v57  ;;  %v298_v12 = vsel %vm295_vm1, %v291_v9, %v292_v6  ;;  %v315_v32 = vsel %vm312_vm3, %v308_v30, %v309_v21  ;;  %v811_v56 = vld [vmem:[%s1181_s7 + $0x28] sm:$0xf0] }
  0xb3   :  { %602 = vmatpush.bf16.msrb.mxu0 %v822_v54  ;;  %863 = vmatpush.bf16.msrb.mxu1 %v822_v54  ;;  %v814_v57 = vor.u32 %v859_v55, %v811_v56  ;;  %v619_v56 = vperm.slane %v617_v49, 0 }
  0xb4   :  { %v228_v63 = vadd.f32 %v868_v44, %v220_v58  ;;  %v801_v58 = vld [vmem:[%s1181_s7 + $0x10] sm:$0xf] }
  0xb6   :  { %v192_v60 = vpop.f32.mrf.mxu0  ;;  %v232_v4 = vmax.f32 %v228_v63, 0.0  ;;  %v803_v63 = vld [vmem:[%s1181_s7 + $0x18] sm:$0xf0] }
  0xb7   :  { %v211_v61 = vpop.f32.mrf.mxu1  ;;  %603 = vmatpush.bf16.msrb.mxu0 %v814_v57  ;;  %864 = vmatpush.bf16.msrb.mxu1 %v814_v57 }
  0xb8   :  { %v212_v62 = vadd.f32 %v211_v61, %v192_v60  ;;  %v310_v15 = vrot.slane %v232_v4, 1  ;;  %v293_v29 = vrot.slane %v232_v4, 7  ;;  %v802_v61 = vor.u32 %v858_v59, %v801_v58 }
  0xb9   :  { %v633_v58 = vperm.slane %v631_v50, 0 }
  0xba   :  { %v221_v0 = vmul.f32 %v867_v41, %v212_v62  ;;  %v314_v27 = vsel %vm312_vm3, %v309_v21, %v310_v15  ;;  %v297_v34 = vsel %vm295_vm1, %v292_v6, %v293_v29  ;;  %v857_v62 = vld [vmem:[%s1181_s7 + $0x14] sm:$0xf]  ;;  %585 = vmatpush.bf16.msrb.mxu3 %v802_v61  ;;  %v870_v21 = vld [vmem:[%s1180_s6] ss:$0 sm:$0xff] }
  0xbb   :  { %v318_v31 = vsel %vm305_vm4, %v314_v27, 0.0  ;;  %v302_v37 = vsel %vm289_vm5, %v297_v34, 0.0 }
  0xbc   :  { %v229_v2 = vadd.f32 %v868_v44, %v221_v0  ;;  %v440_v33 = vpack.c.bf16 %v318_v31, %v315_v32  ;;  %v806_v0 = vor.u32 %v857_v62, %v803_v63 }
  0xbe   :  { %v233_v5 = vmax.f32 %v229_v2, 0.0  ;;  %604 = vmatpush.bf16.msrb.mxu0 %v806_v0  ;;  %865 = vmatpush.bf16.msrb.mxu1 %v806_v0  ;;  %v856_v2 = vld [vmem:[%s1181_s7 + $0x4] sm:$0xf0] }
  0xc0   :  { %v294_v7 = vrot.slane %v233_v5, 7  ;;  %v332_v8 = vpack.c.bf16 %v233_v5, %v232_v4  ;;  %v311_v40 = vrot.slane %v233_v5, 1  ;;  %v794_v4 = vor.u32 %v856_v2, %v793_v1  ;;  %v795_v5 = vld [vmem:[%s1181_s7 + $0x8] sm:$0xf0] }
  0xc1   :  { %v798_v6 = vor.u32 %v855_v3, %v795_v5 }
  0xc2   :  { %754 = vmatmul.msk.bf16.gmra.mxu2 %vm365_vm0, %v332_v8  ;;  %v299_v10 = vsel %vm295_vm1, %v294_v7, %v291_v9  ;;  %v296_v35 = vsel %vm295_vm1, %v293_v29, %v294_v7  ;;  %v316_v41 = vsel %vm312_vm3, %v311_v40, %v308_v30  ;;  %v313_v42 = vsel %vm312_vm3, %v310_v15, %v311_v40 }
  0xc3   :  { %v300_v13 = vsel %vm287_vm2, %v299_v10, 0.0  ;;  %v322_v38 = vpack.c.bf16 %v296_v35, %v302_v37  ;;  %v320_v43 = vsel %vm307_vm6, %v316_v41, 0.0  ;;  %586 = vmatpush.bf16.msrb.mxu3 %v794_v4  ;;  %605 = vmatpush.bf16.msrb.mxu0 %v798_v6 }
  0xc4   :  { %v321_v14 = vpack.c.bf16 %v298_v12, %v300_v13  ;;  %v441_v44 = vpack.c.bf16 %v320_v43, %v313_v42  ;;  %866 = vmatpush.bf16.msrb.mxu1 %v798_v6 }
  0xc6   :  { %771 = vmatmul.msk.bf16.vlgmr.msra.gmra.mxu3 %vm365_vm0, %v321_v14  ;;  %v869_v14 = vld [vmem:[%s1179_s5] ss:$0 sm:$0xff] }
  0xd2   :  { %789 = vmatmul.msk.bf16.vlgmr.msrb.gmra.mxu2 %vm365_vm0, %v440_v33 }
  0xd6   :  { %772 = vmatmul.msk.bf16.gmra.mxu3 %vm365_vm0, %v322_v38 }
  0xe2   :  { %790 = vmatmul.msk.bf16.gmra.mxu2 %vm365_vm0, %v441_v44 }
 0x135   :  { %v381_v51 = vpop.f32.mrf.mxu2 }
 0x13d   :  { %v383_v60 = vpop.f32.mrf.mxu2 }
 0x145   :  { %v386_v7 = vpop.f32.mrf.mxu2 }
 0x149   :  { %v430_v8 = vpop.f32.mrf.mxu3 }
 0x14a   :  { %v431_v12 = vadd.f32 %v430_v8, %v381_v51  ;;  %v620_v51 = vperm.slane %v617_v49, 1 }
 0x14d   :  { %v388_v9 = vpop.f32.mrf.mxu2 }
 0x151   :  { %v432_v10 = vpop.f32.mrf.mxu3 }
 0x152   :  { %v433_v15 = vadd.f32 %v432_v10, %v383_v60 }
 0x155   :  { %v489_v11 = vpop.f32.mrf.mxu2 }
 0x156   :  { %v499_v13 = vadd.f32 %v489_v11, %v431_v12 }
 0x158   :  { %v507_v20 = vmul.f32 %v869_v14, %v499_v13 }
 0x159   :  { %v435_v28 = vpop.f32.mrf.mxu3 }
 0x15a   :  { %v515_v29 = vadd.f32 %v870_v21, %v507_v20  ;;  %v436_v35 = vadd.f32 %v435_v28, %v386_v7 }
 0x15c   :  { %v519_v32 = vmax.f32 %v515_v29, 0.0 }
 0x15d   :  { %v491_v26 = vpop.f32.mrf.mxu2 }
 0x15e   :  { %v500_v27 = vadd.f32 %v491_v26, %v433_v15 }
 0x160   :  { %v508_v30 = vmul.f32 %v869_v14, %v500_v27 }
 0x161   :  { %v437_v38 = vpop.f32.mrf.mxu3 }
 0x162   :  { %v516_v31 = vadd.f32 %v870_v21, %v508_v30  ;;  %v438_v39 = vadd.f32 %v437_v38, %v388_v9 }
 0x164   :  { %v520_v33 = vmax.f32 %v516_v31, 0.0 }
 0x165   :  { %v494_v34 = vpop.f32.mrf.mxu2 }
 0x166   :  { %v523_v36 = vpack.c.bf16 %v520_v33, %v519_v32  ;;  %v501_v37 = vadd.f32 %v494_v34, %v436_v35 }
 0x168   :  { %823 = vmatmul.msk.bf16.vlgmr.msrb.gmra.mxu3 %vm365_vm0, %v523_v36  ;;  %825 = vmatmul.msk.bf16.vlgmr.msrb.gmra.mxu0 %vm365_vm0, %v523_v36  ;;  %v509_v40 = vmul.f32 %v869_v14, %v501_v37 }
 0x16a   :  { %v517_v43 = vadd.f32 %v870_v21, %v509_v40 }
 0x16c   :  { %v521_v46 = vmax.f32 %v517_v43, 0.0 }
 0x16d   :  { %v496_v41 = vpop.f32.mrf.mxu2 }
 0x16e   :  { %v502_v42 = vadd.f32 %v496_v41, %v438_v39 }
 0x170   :  { %v510_v44 = vmul.f32 %v869_v14, %v502_v42 }
 0x172   :  { %v518_v45 = vadd.f32 %v870_v21, %v510_v44 }
 0x174   :  { %v522_v47 = vmax.f32 %v518_v45, 0.0 }
 0x176   :  { %v524_v48 = vpack.c.bf16 %v522_v47, %v521_v46 }
 0x178   :  { %824 = vmatmul.msk.bf16.gmra.mxu3 %vm365_vm0, %v524_v48  ;;  %826 = vmatmul.msk.bf16.vlgmr.msrb.gmra.mxu1 %vm365_vm0, %v524_v48 }
 0x1e5   :  { %v607_v53 = vpop.f32.mrf.mxu0 }
 0x1e6   :  { %v624_v54 = vmul.f32 %v620_v51, %v607_v53 }
 0x1e8   :  { %v638_v55 = vadd.f32 %v634_v52, %v624_v54 }
 0x1ea   :  { %v646_v57 = vadd.f32 %v638_v55, %v987_v18 }
 0x1eb   :  { %v588_v59 = vpop.f32.mrf.mxu3 }
 0x1ec   :  { %v654_v60 = vmax.f32 %v646_v57, 0.0  ;;  %v623_v61 = vmul.f32 %v619_v56, %v588_v59 }
 0x1ed   :  { %v609_v62 = vpop.f32.mrf.mxu0 }
 0x1ee   :  { %662 = vst [vmem:[%s1184_s10 + $0x8] sm:$0xff] %v654_v60  ;;  %v637_v63 = vadd.f32 %v633_v58, %v623_v61  ;;  %v626_v0 = vmul.f32 %v620_v51, %v609_v62 }
 0x1f0   :  { %v645_v1 = vadd.f32 %v637_v63, %v977_v16  ;;  %v640_v2 = vadd.f32 %v634_v52, %v626_v0 }
 0x1f2   :  { %v653_v3 = vmax.f32 %v645_v1, 0.0  ;;  %v648_v4 = vadd.f32 %v640_v2, %v992_v19 }
 0x1f3   :  { %v590_v5 = vpop.f32.mrf.mxu3 }
 0x1f4   :  { %661 = vst [vmem:[%s1184_s10] sm:$0xff] %v653_v3  ;;  %v656_v18 = vmax.f32 %v648_v4, 0.0  ;;  %v625_v6 = vmul.f32 %v619_v56, %v590_v5 }
 0x1f5   :  { %v612_v7 = vpop.f32.mrf.mxu1 }
 0x1f6   :  { %664 = vst [vmem:[%s1184_s10 + $0x18] sm:$0xff] %v656_v18  ;;  %v639_v8 = vadd.f32 %v633_v58, %v625_v6  ;;  %v628_v9 = vmul.f32 %v620_v51, %v612_v7 }
 0x1f8   :  { %v647_v16 = vadd.f32 %v639_v8, %v982_v17  ;;  %v642_v10 = vadd.f32 %v634_v52, %v628_v9 }
 0x1fa   :  { %v655_v11 = vmax.f32 %v647_v16, 0.0  ;;  %v650_v19 = vadd.f32 %v642_v10, %v1011_v24 }
 0x1fb   :  { %v593_v12 = vpop.f32.mrf.mxu3 }
 0x1fc   :  { %663 = vst [vmem:[%s1184_s10 + $0x10] sm:$0xff] %v655_v11  ;;  %v658_v13 = vmax.f32 %v650_v19, 0.0  ;;  %v627_v14 = vmul.f32 %v619_v56, %v593_v12 }
 0x1fd   :  { %v614_v15 = vpop.f32.mrf.mxu1 }
 0x1fe   :  { %666 = vst [vmem:[%s1184_s10 + $0x28] sm:$0xff] %v658_v13  ;;  %v641_v20 = vadd.f32 %v633_v58, %v627_v14  ;;  %v630_v21 = vmul.f32 %v620_v51, %v614_v15 }
 0x200   :  { %v649_v17 = vadd.f32 %v641_v20, %v1001_v22  ;;  %v644_v26 = vadd.f32 %v634_v52, %v630_v21 }
 0x202   :  { %v657_v27 = vmax.f32 %v649_v17, 0.0  ;;  %v652_v24 = vadd.f32 %v644_v26, %v1016_v25 }
 0x203   :  { %v595_v28 = vpop.f32.mrf.mxu3 }
 0x204   :  { %665 = vst [vmem:[%s1184_s10 + $0x20] sm:$0xff] %v657_v27  ;;  %v660_v29 = vmax.f32 %v652_v24, 0.0  ;;  %v629_v30 = vmul.f32 %v619_v56, %v595_v28 }
 0x206   :  { %668 = vst [vmem:[%s1184_s10 + $0x38] sm:$0xff] %v660_v29  ;;  %v643_v31 = vadd.f32 %v633_v58, %v629_v30 }
 0x208   :  { %v651_v32 = vadd.f32 %v643_v31, %v1006_v23 }
 0x20a   :  { %v659_v33 = vmax.f32 %v651_v32, 0.0 }
 0x20c   :  { %667 = vst [vmem:[%s1184_s10 + $0x30] sm:$0xff] %v659_v33 }

</bundles_post_ra>
